<compile_context>
chip_gen: v6e
topology: v6e:2x2x1
jax: 0.10.0
libtpu: 0.0.40
codegen_flags: <defaults>
</compile_context>

<pallas_src>
import jax
import jax.numpy as jnp
from jax.experimental import pallas as pl
from jax.experimental.pallas import tpu as pltpu


def _binary_act_kernel(slope_ref, x_ref, o_ref):
    """Elementwise: round(clip(slope * x, -1, 1) * 0.5 + 0.5), computed in f32."""
    slope = slope_ref[0]                                   # f32 scalar from SMEM
    z = slope * x_ref[...].astype(jnp.float32)
    hard_sig = jnp.clip(z, -1.0, 1.0) * 0.5 + 0.5          # Hardsigmoid
    o_ref[...] = jnp.round(hard_sig).astype(o_ref.dtype)   # RoundST forward
    # TODO(synk): straight-through gradient of RoundST (identity backward) is a
    # training-time autodiff rule, not part of the forward kernel.


def _largest_divisor_leq(n, cap):
    """Largest c in [1, cap] dividing n (trace-time Python ints)."""
    for c in range(min(cap, n), 0, -1):
        if n % c == 0:
            return c
    return 1


def deterministic_binary_activation(x, slope=1.0, *, estimator="ST"):
    assert estimator in ("ST", "REINFORCE")
    if estimator == "REINFORCE":
        # TODO(synk): REINFORCE path requires Bernoulli sampling semantics of
        # RoundREINFORCE; only the deterministic ST path is implemented here.
        raise NotImplementedError("Only estimator='ST' is implemented.")

    orig_shape = x.shape
    orig_dtype = x.dtype
    itemsize = jnp.dtype(orig_dtype).itemsize

    flat = x.reshape(-1)
    n = flat.shape[0]

    # Pad only the (at most 127-element) remainder so the flat length is a
    # multiple of 128 lanes.  For typical feature maps this is a no-op.
    pad = (-n) % 128
    if pad:
        flat = jnp.pad(flat, (0, pad))
    padded_n = n + pad

    # Lane-dense 2-D slab: (R, C) with C a large multiple of 128 (<= 8192).
    groups = padded_n // 128
    c = _largest_divisor_leq(groups, 64)       # C = c * 128 <= 8192
    C = c * 128
    R = groups // c

    # ~1 MiB per block buffer; block rows a multiple of 8 (or the full R).
    target_block_bytes = 1 << 20
    desired_rows = max(1, target_block_bytes // (C * itemsize))
    if desired_rows >= R:
        block_rows = R                          # full dim -> always legal
    else:
        block_rows = max(8, (desired_rows // 8) * 8)
        if block_rows > R:
            block_rows = R

    x2d = flat.reshape(R, C)
    slope_arr = jnp.asarray([slope], dtype=jnp.float32)    # f32 scalar in SMEM

    grid = (pl.cdiv(R, block_rows),)

    out2d = pl.pallas_call(
        _binary_act_kernel,
        out_shape=jax.ShapeDtypeStruct((R, C), orig_dtype),
        grid=grid,
        in_specs=[
            pl.BlockSpec(memory_space=pltpu.SMEM),               # slope scalar
            pl.BlockSpec((block_rows, C), lambda i: (i, 0)),     # x tile
        ],
        out_specs=pl.BlockSpec((block_rows, C), lambda i: (i, 0)),
        compiler_params=pltpu.CompilerParams(
            dimension_semantics=("parallel",)
        ),
    )(slope_arr, x2d)

    out_flat = out2d.reshape(-1)
    if pad:
        out_flat = out_flat[:n]
    return out_flat.reshape(orig_shape)


def _reference(x, slope=1.0):
    """Pure-JAX reference mirroring the PyTorch forward."""
    z = jnp.float32(slope) * x.astype(jnp.float32)
    hard_sig = jnp.clip(z, -1.0, 1.0) * 0.5 + 0.5
    return jnp.round(hard_sig).astype(x.dtype)


if __name__ == "__main__":
    key = jax.random.PRNGKey(0)
    k_x, k_y = jax.random.split(key)

    # NCHW input, as a PyTorch conv feature map would be.
    x = jax.random.normal(k_x, (2, 4, 16, 16), dtype=jnp.float32) * 2.0
    slope = 1.7  # the module accepts (x, slope); exercise the scaled path

    out = jax.block_until_ready(deterministic_binary_activation(x, slope))
    ref = _reference(x, slope)
    assert out.shape == x.shape and out.dtype == x.dtype
    assert jnp.allclose(out, ref), "Pallas kernel mismatch vs reference"

    # Slope-less call path (slope defaults to 1.0).
    out2 = jax.block_until_ready(deterministic_binary_activation(x))
    assert jnp.allclose(out2, _reference(x, 1.0))

    # Odd-sized input to exercise the remainder-padding path.
    y = jax.random.normal(k_y, (3, 5, 7, 11), dtype=jnp.float32)
    out3 = jax.block_until_ready(deterministic_binary_activation(y, 0.5))
    assert out3.shape == y.shape
    assert jnp.allclose(out3, _reference(y, 0.5))

    print("KERNEL_OK")
</pallas_src>

<mosaic_0001>
module attributes {stable_mosaic.version = 11 : i64} {
  func.func @_binary_act_kernel(%arg0: i32, %arg1: memref<1xf32, #tpu.memory_space<smem>>, %arg2: memref<1x2048xf32, #tpu.memory_space<vmem>>, %arg3: memref<1x2048xf32, #tpu.memory_space<vmem>>) attributes {dimension_semantics = [#tpu.dimension_semantics<parallel>], iteration_bounds = array<i64: 1>, scalar_prefetch = 0 : i64, scratch_operands = 0 : i64, tpu.core_type = #tpu.core_type<tc>, window_params = [{transform_indices = @transform_0, window_bounds = array<i64: 1>}, {transform_indices = @transform_1, window_bounds = array<i64: 1, 2048>}, {transform_indices = @transform_2, window_bounds = array<i64: 1, 2048>}]} {
    %c0 = arith.constant 0 : index
    %0 = memref.load %arg1[%c0] : memref<1xf32, #tpu.memory_space<smem>>
    %c0_0 = arith.constant 0 : index
    %c0_1 = arith.constant 0 : index
    %1 = vector.load %arg2[%c0_0, %c0_1] : memref<1x2048xf32, #tpu.memory_space<vmem>>, vector<1x2048xf32>
    %2 = vector.broadcast %0 : f32 to vector<1x2048xf32>
    %3 = arith.mulf %2, %1 : vector<1x2048xf32>
    %cst = arith.constant -1.000000e+00 : f32
    %cst_2 = arith.constant 1.000000e+00 : f32
    %4 = vector.broadcast %cst : f32 to vector<1x2048xf32>
    %5 = arith.maximumf %4, %3 : vector<1x2048xf32>
    %6 = vector.broadcast %cst_2 : f32 to vector<1x2048xf32>
    %7 = arith.minimumf %6, %5 : vector<1x2048xf32>
    %cst_3 = arith.constant 5.000000e-01 : f32
    %8 = vector.broadcast %cst_3 : f32 to vector<1x2048xf32>
    %9 = arith.mulf %7, %8 : vector<1x2048xf32>
    %cst_4 = arith.constant 5.000000e-01 : f32
    %10 = vector.broadcast %cst_4 : f32 to vector<1x2048xf32>
    %11 = arith.addf %9, %10 : vector<1x2048xf32>
    %12 = math.roundeven %11 : vector<1x2048xf32>
    %c0_5 = arith.constant 0 : index
    %c0_6 = arith.constant 0 : index
    %13 = vector.load %arg3[%c0_5, %c0_6] : memref<1x2048xf32, #tpu.memory_space<vmem>>, vector<1x2048xf32>
    tpu.vector_store %arg3[%c0_5, %c0_6], %12 {strides = array<i32>} : memref<1x2048xf32, #tpu.memory_space<vmem>>, vector<1x2048xf32>,
    return
  }
  func.func @transform_0(%arg0: i32) -> i32 {
    %c0_i32 = arith.constant 0 : i32
    %c0_i32_0 = arith.constant 0 : i32
    return %c0_i32 : i32
  }
  func.func @transform_1(%arg0: i32) -> (i32, i32) {
    %c0_i32 = arith.constant 0 : i32
    %c0_i32_0 = arith.constant 0 : i32
    return %arg0, %c0_i32 : i32, i32
  }
  func.func @transform_2(%arg0: i32) -> (i32, i32) {
    %c0_i32 = arith.constant 0 : i32
    %c0_i32_0 = arith.constant 0 : i32
    return %arg0, %c0_i32 : i32, i32
  }
}

</mosaic_0001>

<bundles_post_ra>
// kernel: tpu_custom_call.1
= control target key start
LH: loop header
LB: loop body
LE: loop exit
PB: predicated region body
PF: predicated region fallthrough
CT: control target
= control target key end

     0   :  { %8 = vsyncpa [#allocation4], 0  ;;  %s148_s0 = inlined_call_operand.<no memory space> [shape: f32[1], index: 0, kind: input, shape index: {}]   ;;  %s149_s1 = inlined_call_operand.hbm [shape: f32[1,2048], index: 1, kind: input, shape index: {}]   ;;  %s150_s2 = inlined_call_operand.hbm [shape: f32[1,2048], index: 2, kind: output, shape index: {}]  }
   0x1   :  { %9 = vsyncpa [#allocation5], 0  ;;  %s122_s9 = smov [#allocation3]  }
   0x2   :  { %s18_s10 = sshll.u32 %s122_s9, 4  ;;  %s19_s10 = int_to_ptr.vmem [resolvable:$true] %s18_s10 }
   0x3   :  { %s86_s11 = scalar_lea.vmem %s19_s10, 256  ;;  %p91_p1 = scmp.lt.s32.totalorder %s19_s10, %s19_s10 }
   0x4   :  { %p87_p0 = scmp.ne.s32.totalorder %s19_s10, %s86_s11  ;;  %p92_p2 = scmp.lt.s32.totalorder %s86_s11, %s86_s11 }
   0x6   :  { %p93_p3 = por %p92_p2, %p91_p1 }
   0x8   :  { %p94_p4 = pnand %p93_p3, %p87_p0 }
   0xa   :  { %97 = shalt.err (!%p94_p4)
}
   0xb   :  { %21 = dma.hbm_to_vmem [thread:$0]  %s149_s1, 256, %s19_s10, [#allocation4]  }
   0xc   :  { %118 = dma.done.wait [#allocation4], 256  }
   0xd   :  { %119 = vsyncadd [#allocation4], 4294967040  ;;  %v28_v0 = vstv %s148_s0  ;;  %v26_v1 = vld [vmem:[#allocation3] sm:$0xff]  ;;  %v27_v2 = vld [vmem:[#allocation3 + $0x8] sm:$0xff]  ;;  %s123_s0 = smov [#allocation6]  }
   0xe   :  { %v29_v3 = vmul.f32 %v28_v0, %v26_v1  ;;  %v30_v4 = vmul.f32 %v28_v0, %v27_v2  ;;  %s49_s1 = sshll.u32 %s123_s0, 4  ;;  %s50_s1 = int_to_ptr.vmem [resolvable:$true] %s49_s1 }
   0xf   :  { %s98_s16 = scalar_lea.vmem %s50_s1, 256  ;;  %p103_p6 = scmp.lt.s32.totalorder %s50_s1, %s50_s1 }
  0x10   :  { %v58_v5 = vclamps-f32 %v29_v3, 1.0  ;;  %v59_v6 = vclamps-f32 %v30_v4, 1.0  ;;  %p99_p5 = scmp.ne.s32.totalorder %s50_s1, %s98_s16  ;;  %p104_p7 = scmp.lt.s32.totalorder %s98_s16, %s98_s16 }
  0x12   :  { %v35_v7 = vmul.f32 0.5, %v58_v5  ;;  %v36_v8 = vmul.f32 0.5, %v59_v6  ;;  %p105_p8 = por %p104_p7, %p103_p6 }
  0x14   :  { %v37_v9 = vadd.f32 0.5, %v35_v7  ;;  %v38_v10 = vadd.f32 0.5, %v36_v8  ;;  %p106_p9 = pnand %p105_p8, %p99_p5 }
  0x16   :  { %v62_v11 = vcvt.f32.s32 %v37_v9  ;;  %v60_v12 = vand.u32 2147483647, %v37_v9  ;;  %v70_v13 = vcvt.f32.s32 %v38_v10  ;;  %v65_v15 = vand.u32 2147483648, %v37_v9 }
  0x17   :  { %v68_v16 = vand.u32 2147483647, %v38_v10  ;;  %v73_v18 = vand.u32 2147483648, %v38_v10 }
  0x18   :  { %v63_v14 = vcvt.s32.f32 %v62_v11  ;;  %v71_v17 = vcvt.s32.f32 %v70_v13  ;;  %vm61_vm0 = vcmp.lt.f32.partialorder %v60_v12, 8388608.0 }
  0x19   :  { %vm69_vm1 = vcmp.lt.f32.partialorder %v68_v16, 8388608.0 }
  0x1a   :  { %v64_v19 = vand.u32 2147483647, %v63_v14  ;;  %v72_v20 = vand.u32 2147483647, %v71_v17 }
  0x1c   :  { %v66_v21 = vor.u32 %v65_v15, %v64_v19  ;;  %v74_v22 = vor.u32 %v73_v18, %v72_v20 }
  0x1e   :  { %v67_v23 = vsel %vm61_vm0, %v66_v21, %v37_v9  ;;  %v75_v24 = vsel %vm69_vm1, %v74_v22, %v38_v10 }
  0x1f   :  { %41 = vst [vmem:[#allocation6] sm:$0xff] %v67_v23  ;;  %42 = vst [vmem:[#allocation6 + $0x8] sm:$0xff] %v75_v24 }
  0x20   :  { %109 = shalt.err (!%p106_p9)
}
  0x21   :  { %52 = dma.vmem_to_hbm [thread:$0]  %s50_s1, 256, %s150_s2, [#allocation5]  }
  0x22   :  { %120 = dma.done.wait [#allocation5], 256  }
  0x23   :  { %121 = vsyncadd [#allocation5], 4294967040 }
  0x24   :  { %56 = vsyncpa [#allocation4], 1 }
  0x25   :  { %57 = vsyncpa [#allocation5], 1 }

</bundles_post_ra>
